<compile_context>
chip_gen: v6e
topology: v6e:2x2x1
jax: 0.10.0
libtpu: 0.0.40
codegen_flags: <defaults>
</compile_context>

<pallas_src>
import functools

import jax
import jax.numpy as jnp
from jax.experimental import pallas as pl
from jax.experimental.pallas import tpu as pltpu


def _cdiv(a, b):
    return -(-a // b)


# ----------------------------------------------------------------------------
# Shared online-logsumexp tile update (native layout: mc on sublanes).
# ----------------------------------------------------------------------------
def _online_logsumexp_update(lw_ref, tile_idx, m_ref, s_ref, *, mc, block_m):
    """Fold one (block_m, nobj) tile into the running (max, sum-exp) state.

    m_ref / s_ref are (1, nobj) refs holding the running max and running
    sum(exp(. - max)).  tile_idx is the (unclamped) tile index along mc; rows
    whose absolute index >= mc are masked to -inf, which also makes fully
    out-of-range duplicate tiles exact no-ops.
    """
    lw = lw_ref[...].astype(jnp.float32)                     # (block_m, nobj)
    row = jax.lax.broadcasted_iota(jnp.int32, lw.shape, 0)
    valid = (tile_idx * block_m + row) < mc
    lw = jnp.where(valid, lw, -jnp.inf)

    tile_max = jnp.max(lw, axis=0, keepdims=True)            # (1, nobj)
    m_run = m_ref[...]
    m_new = jnp.maximum(m_run, tile_max)                     # NaN-propagating
    alpha = jnp.exp(m_run - m_new)
    p_sum = jnp.sum(jnp.exp(lw - m_new), axis=0, keepdims=True)
    s_new = alpha * s_ref[...] + p_sum
    # Keep all-(-inf)-so-far columns clean (0) so a later finite tile recovers;
    # columns that stay all -inf are mapped to 0 at finalize (torch NaN -> 0).
    s_new = jnp.where(m_new == -jnp.inf, jnp.zeros_like(s_new), s_new)
    m_ref[...] = m_new
    s_ref[...] = s_new


# ----------------------------------------------------------------------------
# Kernel A: serial scan over mc + fused scalar epilogue (single dispatch).
# ----------------------------------------------------------------------------
def _mcpl_fused_kernel(lw_ref, ct_ref, nf_ref, out_ref, m_scr, s_scr,
                       *, mc, block_m, nobj):
    k = pl.program_id(0)

    @pl.when(k == 0)
    def _():
        m_scr[...] = jnp.full_like(m_scr, -jnp.inf)
        s_scr[...] = jnp.zeros_like(s_scr)

    _online_logsumexp_update(lw_ref, k, m_scr, s_scr, mc=mc, block_m=block_m)

    @pl.when(k == pl.num_programs(0) - 1)
    def _():
        m_fin = m_scr[...]                                   # (1, nobj)
        lse = jnp.log(s_scr[...]) + m_fin                    # logsumexp over mc
        loss = ct_ref[...] + lse
        loss = jnp.where(jnp.isnan(loss) | (m_fin == -jnp.inf),
                         jnp.zeros_like(loss), loss)
        scale = 1.0 / (jnp.float32(nobj) * nf_ref[0, 0])     # mean + /norm_factor
        out_ref[...] = jnp.sum(loss, axis=1, keepdims=True) * scale


# ----------------------------------------------------------------------------
# Kernel B: mc split over a leading parallel axis; per-split (m, s) partials.
# The output blocks themselves are the accumulators (resident across k).
# ----------------------------------------------------------------------------
def _mcpl_partial_kernel(lw_ref, m_out, s_out, *, mc, block_m, tiles_per_split):
    s_idx = pl.program_id(0)
    k = pl.program_id(1)

    @pl.when(k == 0)
    def _():
        m_out[...] = jnp.full_like(m_out, -jnp.inf)
        s_out[...] = jnp.zeros_like(s_out)

    tile_idx = s_idx * tiles_per_split + k                   # unclamped (for mask)
    _online_logsumexp_update(lw_ref, tile_idx, m_out, s_out,
                             mc=mc, block_m=block_m)


# ----------------------------------------------------------------------------
# Wrapper.
# ----------------------------------------------------------------------------
@functools.partial(jax.jit, static_argnames=("block_m", "num_splits"))
def monte_carlo_pose_loss(pose_sample_logweights, cost_target,
                          norm_factor_buffer, *, block_m=None, num_splits=None):
    """Pure functional forward.  norm_factor_buffer is the (already updated)
    running buffer; returns the scalar loss."""
    lw = jnp.asarray(pose_sample_logweights)                 # (mc, num_obj)
    if lw.dtype not in (jnp.float32, jnp.bfloat16):
        lw = lw.astype(jnp.float32)
    ct = jnp.asarray(cost_target, jnp.float32)               # (num_obj,)
    nf = jnp.asarray(norm_factor_buffer, jnp.float32)        # ()
    mc, nobj = lw.shape

    # --- tile sizing: native layout, zero padding ---------------------------
    itemsize = jnp.dtype(lw.dtype).itemsize
    mult = 16 if lw.dtype == jnp.bfloat16 else 8             # sublane granularity
    if block_m is None:
        target_bytes = 2 << 20                               # ~2 MiB / pipeline buf
        bm = max(mult, (target_bytes // (nobj * itemsize)) // mult * mult)
    else:
        bm = max(mult, (int(block_m) // mult) * mult)
    if bm >= mc:
        bm = mc                                              # single full-extent tile
    num_k = _cdiv(mc, bm)

    if num_splits is None:
        # Split the mc reduction only when there is real work to shard
        # (benefits v7x's 2 TensorCores; ~0 effect on single-core v5e/v6e).
        num_splits = 2 if num_k >= 4 else 1
    num_splits = max(1, min(int(num_splits), num_k))

    ct2 = ct.reshape(1, nobj)

    if num_splits == 1:
        # Single serial scan over mc; full epilogue fused into the kernel.
        nf2 = nf.reshape(1, 1)
        kern = functools.partial(_mcpl_fused_kernel, mc=mc, block_m=bm, nobj=nobj)
        out = pl.pallas_call(
            kern,
            out_shape=jax.ShapeDtypeStruct((1, 1), jnp.float32),
            grid_spec=pltpu.PrefetchScalarGridSpec(
                num_scalar_prefetch=0,
                grid=(num_k,),
                in_specs=[
                    # TODO(synk): if xprof still shows exposed DMA at this tile
                    # size, add pipeline_mode=pl.Buffered(3) here.
                    pl.BlockSpec((bm, nobj), lambda k: (k, 0)),
                    pl.BlockSpec((1, nobj), lambda k: (0, 0)),
                    pl.BlockSpec(memory_space=pltpu.MemorySpace.SMEM),
                ],
                out_specs=pl.BlockSpec((1, 1), lambda k: (0, 0)),
                scratch_shapes=[
                    pltpu.VMEM((1, nobj), jnp.float32),      # running max
                    pltpu.VMEM((1, nobj), jnp.float32),      # running sum(exp)
                ],
            ),
            compiler_params=pltpu.CompilerParams(
                dimension_semantics=("arbitrary",)),
        )(lw, ct2, nf2)
        return out[0, 0]

    # --- mc split across a leading parallel axis (both v7x TensorCores) -----
    tiles_per_split = _cdiv(num_k, num_splits)
    last_tile = num_k - 1
    kern = functools.partial(_mcpl_partial_kernel, mc=mc, block_m=bm,
                             tiles_per_split=tiles_per_split)
    m_parts, s_parts = pl.pallas_call(
        kern,
        out_shape=(jax.ShapeDtypeStruct((num_splits, 1, nobj), jnp.float32),
                   jax.ShapeDtypeStruct((num_splits, 1, nobj), jnp.float32)),
        grid_spec=pltpu.PrefetchScalarGridSpec(
            num_scalar_prefetch=0,
            grid=(num_splits, tiles_per_split),
            in_specs=[
                # Clamp duplicate trailing tiles of the last split to the last
                # real tile (they are fully masked off in-kernel).
                pl.BlockSpec(
                    (bm, nobj),
                    lambda s, k: (jnp.minimum(s * tiles_per_split + k,
                                              last_tile), 0)),
            ],
            out_specs=[
                pl.BlockSpec((None, 1, nobj), lambda s, k: (s, 0, 0)),
                pl.BlockSpec((None, 1, nobj), lambda s, k: (s, 0, 0)),
            ],
        ),
        compiler_params=pltpu.CompilerParams(
            dimension_semantics=("parallel", "arbitrary")),
    )(lw)

    # Tiny logsumexp merge of the per-split partials + epilogue (one small
    # fused XLA op; only taken for large-mc problems where it is negligible).
    m_parts = m_parts[:, 0, :]                               # (num_splits, nobj)
    s_parts = s_parts[:, 0, :]
    m = jnp.max(m_parts, axis=0)                             # (nobj,)
    alpha = jnp.where(m_parts == -jnp.inf, 0.0, jnp.exp(m_parts - m[None, :]))
    s = jnp.sum(s_parts * alpha, axis=0)                     # (nobj,)
    lse = jnp.log(s) + m
    loss = ct + lse
    loss = jnp.where(jnp.isnan(loss) | (m == -jnp.inf), 0.0, loss)
    return jnp.sum(loss) / (jnp.float32(nobj) * nf)


class MonteCarloPoseLoss:
    """JAX/Pallas port of the PyTorch MonteCarloPoseLoss module.

    The running norm_factor buffer is threaded explicitly (functional update
    stored back on the Python object).
    """
    # TODO(synk): the buffer update mutates Python state outside jit; thread it
    # explicitly if this needs to live inside jit / scan / pmap.

    def __init__(self, init_norm_factor=1.0, momentum=0.01):
        self.norm_factor = jnp.asarray(init_norm_factor, dtype=jnp.float32)
        self.momentum = float(momentum)
        self.training = True

    def __call__(self, pose_sample_logweights, cost_target, norm_factor):
        if self.training:
            nf_arg = jnp.asarray(norm_factor, jnp.float32)
            new_buf = (1.0 - self.momentum) * self.norm_factor \
                      + self.momentum * nf_arg
            self.norm_factor = jax.lax.stop_gradient(new_buf)
        return monte_carlo_pose_loss(pose_sample_logweights, cost_target,
                                     self.norm_factor)


def _torch_ref(lw, ct, nf_buf):
    """Pure-JAX replica of the torch forward (given the updated buffer)."""
    mx = jnp.max(lw, axis=0, keepdims=True)
    lse = jnp.log(jnp.sum(jnp.exp(lw - mx), axis=0)) + mx[0]
    lp = ct + lse
    lp = jnp.where(jnp.isnan(lp), 0.0, lp)
    return jnp.mean(lp) / nf_buf


if __name__ == "__main__":
    key = jax.random.PRNGKey(0)
    k1, k2, k3 = jax.random.split(key, 3)

    # Small shape consistent with the module: (mc_samples, num_obj)
    mc_samples, num_obj = 32, 16
    pose_sample_logweights = jax.random.normal(
        k1, (mc_samples, num_obj), dtype=jnp.float32)
    cost_target = jax.random.uniform(k2, (num_obj,), dtype=jnp.float32)
    norm_factor = jax.random.uniform(k3, (), dtype=jnp.float32) + 0.5

    loss_mod = MonteCarloPoseLoss(init_norm_factor=1.0, momentum=0.01)
    loss = loss_mod(pose_sample_logweights, cost_target, norm_factor)
    jax.block_until_ready(loss)

    ref_buf = (1.0 - 0.01) * 1.0 + 0.01 * norm_factor
    ref = _torch_ref(pose_sample_logweights, cost_target, ref_buf)
    assert jnp.allclose(loss, ref, rtol=1e-5, atol=1e-5), (loss, ref)

    # Multi-tile + ragged tail + -inf columns (NaN->0 parity), fused path.
    k4, k5, k6 = jax.random.split(jax.random.PRNGKey(1), 3)
    mc2, nobj2 = 1000, 20
    lw2 = jax.random.normal(k4, (mc2, nobj2), dtype=jnp.float32)
    lw2 = lw2.at[:, 3].set(-jnp.inf)      # all-(-inf) column -> NaN -> 0
    lw2 = lw2.at[:400, 7].set(-jnp.inf)   # leading -inf block, finite later
    ct2 = jax.random.uniform(k5, (nobj2,), dtype=jnp.float32)
    nf_buf2 = jax.random.uniform(k6, (), dtype=jnp.float32) + 0.5
    ref2 = _torch_ref(lw2, ct2, nf_buf2)

    out_fused = monte_carlo_pose_loss(lw2, ct2, nf_buf2,
                                      block_m=256, num_splits=1)
    jax.block_until_ready(out_fused)
    assert jnp.allclose(out_fused, ref2, rtol=1e-5, atol=1e-5), (out_fused, ref2)

    # Same problem via the split path (v7x both-TensorCores layout), with a
    # ragged tile count so the clamped/empty duplicate tile is exercised.
    out_split = monte_carlo_pose_loss(lw2, ct2, nf_buf2,
                                      block_m=128, num_splits=3)
    jax.block_until_ready(out_split)
    assert jnp.allclose(out_split, ref2, rtol=1e-5, atol=1e-5), (out_split, ref2)

    print("KERNEL_OK")
</pallas_src>

<mosaic_0001>
module attributes {stable_mosaic.version = 11 : i64} {
  func.func @_mcpl_fused_kernel(%arg0: i32, %arg1: memref<32x16xf32, #tpu.memory_space<vmem>>, %arg2: memref<1x16xf32, #tpu.memory_space<vmem>>, %arg3: memref<1x1xf32, #tpu.memory_space<smem>>, %arg4: memref<1x1xf32, #tpu.memory_space<vmem>>, %arg5: memref<1x16xf32, #tpu.memory_space<vmem>>, %arg6: memref<1x16xf32, #tpu.memory_space<vmem>>) attributes {dimension_semantics = [#tpu.dimension_semantics<arbitrary>], iteration_bounds = array<i64: 1>, scalar_prefetch = 0 : i64, scratch_operands = 2 : i64, tpu.core_type = #tpu.core_type<tc>, window_params = [{transform_indices = @transform_0, window_bounds = array<i64: 32, 16>}, {pipeline_mode = #tpu.pipeline_mode<synchronous>, transform_indices = @transform_1, window_bounds = array<i64: 1, 16>}, {transform_indices = @transform_2, window_bounds = array<i64: 1, 1>}, {pipeline_mode = #tpu.pipeline_mode<synchronous>, transform_indices = @transform_3, window_bounds = array<i64: 1, 1>}]} {
    %c0_i32 = arith.constant 0 : i32
    %0 = arith.cmpi eq, %arg0, %c0_i32 : i32
    %1 = arith.extui %0 : i1 to i32
    %c0_i32_0 = arith.constant 0 : i32
    %2 = arith.cmpi ne, %1, %c0_i32_0 : i32
    scf.if %2 {
      %cst_17 = arith.constant 0xFF800000 : f32
      %35 = vector.broadcast %cst_17 : f32 to vector<1x16xf32>
      %c0_18 = arith.constant 0 : index
      %c0_19 = arith.constant 0 : index
      %36 = vector.load %arg5[%c0_18, %c0_19] : memref<1x16xf32, #tpu.memory_space<vmem>>, vector<1x16xf32>
      tpu.vector_store %arg5[%c0_18, %c0_19], %35 {strides = array<i32>} : memref<1x16xf32, #tpu.memory_space<vmem>>, vector<1x16xf32>,
      %cst_20 = arith.constant 0.000000e+00 : f32
      %37 = vector.broadcast %cst_20 : f32 to vector<1x16xf32>
      %c0_21 = arith.constant 0 : index
      %c0_22 = arith.constant 0 : index
      %38 = vector.load %arg6[%c0_21, %c0_22] : memref<1x16xf32, #tpu.memory_space<vmem>>, vector<1x16xf32>
      tpu.vector_store %arg6[%c0_21, %c0_22], %37 {strides = array<i32>} : memref<1x16xf32, #tpu.memory_space<vmem>>, vector<1x16xf32>,
    } else {
    }
    %c0 = arith.constant 0 : index
    %c0_1 = arith.constant 0 : index
    %3 = vector.load %arg1[%c0, %c0_1] : memref<32x16xf32, #tpu.memory_space<vmem>>, vector<32x16xf32>
    %4 = tpu.iota {dimensions = array<i32: 0>} : vector<32x16xi32>
    %c32_i32 = arith.constant 32 : i32
    %5 = arith.muli %arg0, %c32_i32 : i32
    %6 = vector.broadcast %5 : i32 to vector<32x16xi32>
    %7 = arith.addi %6, %4 : vector<32x16xi32>
    %c32_i32_2 = arith.constant 32 : i32
    %8 = vector.broadcast %c32_i32_2 : i32 to vector<32x16xi32>
    %9 = arith.cmpi slt, %7, %8 : vector<32x16xi32>
    %cst = arith.constant 0xFF800000 : f32
    %10 = vector.broadcast %cst : f32 to vector<32x16xf32>
    %11 = arith.select %9, %3, %10 : vector<32x16xi1>, vector<32x16xf32>
    %cst_3 = arith.constant dense<0xFF800000> : vector<16xf32>
    %12 = vector.multi_reduction <maximumf>, %11, %cst_3 [0] : vector<32x16xf32> to vector<16xf32>
    %13 = vector.shape_cast %12 : vector<16xf32> to vector<1x16xf32>
    %c0_4 = arith.constant 0 : index
    %c0_5 = arith.constant 0 : index
    %14 = vector.load %arg5[%c0_4, %c0_5] : memref<1x16xf32, #tpu.memory_space<vmem>>, vector<1x16xf32>
    %15 = arith.maximumf %14, %13 : vector<1x16xf32>
    %16 = arith.subf %14, %15 : vector<1x16xf32>
    %17 = math.exp %16 : vector<1x16xf32>
    %18 = vector.broadcast %15 : vector<1x16xf32> to vector<32x16xf32>
    %19 = arith.subf %11, %18 : vector<32x16xf32>
    %20 = math.exp %19 : vector<32x16xf32>
    %cst_6 = arith.constant dense<0.000000e+00> : vector<16xf32>
    %21 = vector.multi_reduction <add>, %20, %cst_6 [0] : vector<32x16xf32> to vector<16xf32>
    %22 = vector.shape_cast %21 : vector<16xf32> to vector<1x16xf32>
    %c0_7 = arith.constant 0 : index
    %c0_8 = arith.constant 0 : index
    %23 = vector.load %arg6[%c0_7, %c0_8] : memref<1x16xf32, #tpu.memory_space<vmem>>, vector<1x16xf32>
    %24 = arith.mulf %17, %23 : vector<1x16xf32>
    %25 = arith.addf %24, %22 : vector<1x16xf32>
    %cst_9 = arith.constant 0xFF800000 : f32
    %26 = vector.broadcast %cst_9 : f32 to vector<1x16xf32>
    %27 = arith.cmpf oeq, %15, %26 : vector<1x16xf32>
    %cst_10 = arith.constant 0.000000e+00 : f32
    %28 = vector.broadcast %cst_10 : f32 to vector<1x16xf32>
    %29 = arith.select %27, %28, %25 : vector<1x16xi1>, vector<1x16xf32>
    %c0_11 = arith.constant 0 : index
    %c0_12 = arith.constant 0 : index
    %30 = vector.load %arg5[%c0_11, %c0_12] : memref<1x16xf32, #tpu.memory_space<vmem>>, vector<1x16xf32>
    tpu.vector_store %arg5[%c0_11, %c0_12], %15 {strides = array<i32>} : memref<1x16xf32, #tpu.memory_space<vmem>>, vector<1x16xf32>,
    %c0_13 = arith.constant 0 : index
    %c0_14 = arith.constant 0 : index
    %31 = vector.load %arg6[%c0_13, %c0_14] : memref<1x16xf32, #tpu.memory_space<vmem>>, vector<1x16xf32>
    tpu.vector_store %arg6[%c0_13, %c0_14], %29 {strides = array<i32>} : memref<1x16xf32, #tpu.memory_space<vmem>>, vector<1x16xf32>,
    %c0_i32_15 = arith.constant 0 : i32
    %32 = arith.cmpi eq, %arg0, %c0_i32_15 : i32
    %33 = arith.extui %32 : i1 to i32
    %c0_i32_16 = arith.constant 0 : i32
    %34 = arith.cmpi ne, %33, %c0_i32_16 : i32
    scf.if %34 {
      %c0_17 = arith.constant 0 : index
      %c0_18 = arith.constant 0 : index
      %35 = vector.load %arg5[%c0_17, %c0_18] : memref<1x16xf32, #tpu.memory_space<vmem>>, vector<1x16xf32>
      %c0_19 = arith.constant 0 : index
      %c0_20 = arith.constant 0 : index
      %36 = vector.load %arg6[%c0_19, %c0_20] : memref<1x16xf32, #tpu.memory_space<vmem>>, vector<1x16xf32>
      %37 = math.log %36 : vector<1x16xf32>
      %38 = arith.addf %37, %35 : vector<1x16xf32>
      %c0_21 = arith.constant 0 : index
      %c0_22 = arith.constant 0 : index
      %39 = vector.load %arg2[%c0_21, %c0_22] : memref<1x16xf32, #tpu.memory_space<vmem>>, vector<1x16xf32>
      %40 = arith.addf %39, %38 : vector<1x16xf32>
      %41 = arith.cmpf one, %40, %40 : vector<1x16xf32>
      %cst_23 = arith.constant 0xFF800000 : f32
      %42 = vector.broadcast %cst_23 : f32 to vector<1x16xf32>
      %43 = arith.cmpf oeq, %35, %42 : vector<1x16xf32>
      %44 = arith.ori %41, %43 : vector<1x16xi1>
      %cst_24 = arith.constant 0.000000e+00 : f32
      %45 = vector.broadcast %cst_24 : f32 to vector<1x16xf32>
      %46 = arith.select %44, %45, %40 : vector<1x16xi1>, vector<1x16xf32>
      %c0_25 = arith.constant 0 : index
      %c0_26 = arith.constant 0 : index
      %47 = memref.load %arg3[%c0_25, %c0_26] : memref<1x1xf32, #tpu.memory_space<smem>>
      %cst_27 = arith.constant 1.600000e+01 : f32
      %48 = arith.mulf %cst_27, %47 : f32
      %cst_28 = arith.constant 1.000000e+00 : f32
      %49 = arith.divf %cst_28, %48 : f32
      %cst_29 = arith.constant dense<0.000000e+00> : vector<1xf32>
      %50 = vector.multi_reduction <add>, %46, %cst_29 [1] : vector<1x16xf32> to vector<1xf32>
      %51 = vector.shape_cast %50 : vector<1xf32> to vector<1x1xf32>
      %52 = vector.broadcast %49 : f32 to vector<1x1xf32>
      %53 = arith.mulf %51, %52 : vector<1x1xf32>
      %c0_30 = arith.constant 0 : index
      %c0_31 = arith.constant 0 : index
      %54 = vector.load %arg4[%c0_30, %c0_31] : memref<1x1xf32, #tpu.memory_space<vmem>>, vector<1x1xf32>
      tpu.vector_store %arg4[%c0_30, %c0_31], %53 {strides = array<i32>} : memref<1x1xf32, #tpu.memory_space<vmem>>, vector<1x1xf32>,
    } else {
    }
    return
  }
  func.func @transform_0(%arg0: i32) -> (i32, i32) {
    %c0_i32 = arith.constant 0 : i32
    %c0_i32_0 = arith.constant 0 : i32
    return %arg0, %c0_i32 : i32, i32
  }
  func.func @transform_1(%arg0: i32) -> (i32, i32) {
    %c0_i32 = arith.constant 0 : i32
    %c0_i32_0 = arith.constant 0 : i32
    %c0_i32_1 = arith.constant 0 : i32
    return %c0_i32, %c0_i32_0 : i32, i32
  }
  func.func @transform_2(%arg0: i32) -> (i32, i32) {
    %c0_i32 = arith.constant 0 : i32
    %c0_i32_0 = arith.constant 0 : i32
    %c0_i32_1 = arith.constant 0 : i32
    return %c0_i32, %c0_i32_0 : i32, i32
  }
  func.func @transform_3(%arg0: i32) -> (i32, i32) {
    %c0_i32 = arith.constant 0 : i32
    %c0_i32_0 = arith.constant 0 : i32
    %c0_i32_1 = arith.constant 0 : i32
    return %c0_i32, %c0_i32_0 : i32, i32
  }
}

</mosaic_0001>

<bundles_post_ra>
// kernel: monte_carlo_pose_loss.1
= control target key start
LH: loop header
LB: loop body
LE: loop exit
PB: predicated region body
PF: predicated region fallthrough
CT: control target
= control target key end

     0   :  { %vm20_vm0 = vcmask 122880   ;;  %v185_v3 = vmov -inf   ;;  %v186_v4 = vmov 0.0   ;;  %vm46_vm1 = vcmask 130048   ;;  %s242_s0 = inlined_call_operand.vmem [shape: f32[32,16], index: 0, kind: input, shape index: {}]   ;;  %s243_s1 = inlined_call_operand.vmem [shape: f32[1,16], index: 1, kind: input, shape index: {}]   ;;  %s244_s2 = inlined_call_operand.<no memory space> [shape: f32[1,1], index: 2, kind: input, shape index: {}]   ;;  %s245_s3 = inlined_call_operand.hbm [shape: f32[1,1], index: 3, kind: output, shape index: {}]  }
   0x1   :  { %v23_v0 = vld [vmem:[%s242_s0] sm:$0xff]  ;;  %v24_v1 = vld [vmem:[%s242_s0 + $0x8] sm:$0xff]  ;;  %v25_v2 = vld [vmem:[%s242_s0 + $0x10] sm:$0xff]  ;;  %21 = vst.msk [vmem:[#allocation2] sm:$0x1] %vm20_vm0, %v185_v3  ;;  %s119_s22 = smul.f32 16.0, %s244_s2 }
   0x2   :  { %22 = vst.msk [vmem:[#allocation3] sm:$0x1] %vm20_vm0, %v186_v4  ;;  %v26_v5 = vld [vmem:[%s242_s0 + $0x18] sm:$0xff]  ;;  %v47_v6 = vsel %vm46_vm1, %v23_v0, -inf  ;;  %v48_v7 = vsel %vm46_vm1, %v24_v1, -inf  ;;  %v49_v8 = vsel %vm46_vm1, %v25_v2, -inf }
   0x3   :  { %v50_v9 = vsel %vm46_vm1, %v26_v5, -inf }
   0x4   :  { %9 = vsyncpa [#allocation6], 0  ;;  %v51_v10 = vmax.f32 %v47_v6, %v48_v7  ;;  %v52_v11 = vmax.f32 %v49_v8, %v50_v9  ;;  %v120_v12 = vstv %s119_s22  ;;  %v66_v16 = vlaneseq  ;;  %v112_v63 = vld [vmem:[%s243_s1] sm:$0x1]  ;;  %s187_s24 = smov [#allocation5]  }
   0x5   :  { %149 = vrcp.f32 %v120_v12  ;;  %s136_s25 = sshll.u32 %s187_s24, 4  ;;  %vm128_vm6 = vcmask 0   ;;  %s137_s25 = int_to_ptr.vmem [resolvable:$true] %s136_s25 }
   0x6   :  { %v53_v13 = vmax.f32 %v51_v10, %v52_v11  ;;  %v67_v19 = vshrl.u32 %v66_v16, 7  ;;  %s163_s26 = scalar_lea.vmem %s137_s25, 16  ;;  %s167_s1 = scalar_lea.vmem %s137_s25, 32 }
   0x7   :  { %p164_p0 = scmp.ne.s32.totalorder %s137_s25, %s163_s26  ;;  %p168_p1 = scmp.lt.s32.totalorder %s137_s25, %s137_s25 }
   0x8   :  { %v54_v14 = vrot.slane %v53_v13, 4  ;;  %v60_v21 = vld [vmem:[#allocation2] sm:$0x1]  ;;  %v68_v24 = vsub.s32 0, %v67_v19  ;;  %p169_p2 = scmp.lt.s32.totalorder %s167_s1, %s163_s26 }
   0x9   :  { %v96_v52 = vld [vmem:[#allocation3] sm:$0x1] }
   0xa   :  { %v55_v15 = vmax.f32 %v53_v13, %v54_v14  ;;  %p170_p3 = por %p169_p2, %p168_p1 }
   0xc   :  { %v56_v17 = vrot.slane %v55_v15, 2  ;;  %p171_p4 = pnand %p170_p3, %p164_p0 }
   0xe   :  { %v57_v18 = vmax.f32 %v55_v15, %v56_v17 }
  0x10   :  { %v58_v20 = vrot.slane %v57_v18, 1 }
  0x12   :  { %v150_v22 = vpop.eup %149  ;;  %v59_v23 = vmax.f32 %v57_v18, %v58_v20 }
  0x13   :  { %144 = vpush %v150_v22 }
  0x14   :  { %v61_v25 = vmax.f32 %v60_v21, %v59_v23 }
  0x16   :  { %v69_v26 = vrot.slane %v61_v25, %v68_v24  ;;  %102 = vst.msk [vmem:[#allocation2] sm:$0x1] %vm20_vm0, %v61_v25  ;;  %v62_v35 = vsub.f32 %v60_v21, %v61_v25  ;;  %vm99_vm2 = vcmp.eq.f32.partialorder %v61_v25, -inf }
  0x18   :  { %v71_v27 = vsub.f32 %v23_v0, %v69_v26  ;;  %v72_v28 = vsub.f32 %v24_v1, %v69_v26  ;;  %v73_v29 = vsub.f32 %v25_v2, %v69_v26  ;;  %v74_v30 = vsub.f32 %v26_v5, %v69_v26 }
  0x19   :  { %v63_v36 = vmul.f32 1.442695, %v62_v35 }
  0x1a   :  { %v75_v31 = vmul.f32 1.442695, %v71_v27  ;;  %v77_v32 = vmul.f32 1.442695, %v72_v28  ;;  %v79_v33 = vmul.f32 1.442695, %v73_v29 }
  0x1b   :  { %v81_v34 = vmul.f32 1.442695, %v74_v30 }
  0x1c   :  { %151 = vpow2.f32 %v75_v31 }
  0x1d   :  { %153 = vpow2.f32 %v77_v32  ;;  %v107_v61 = vld [vmem:[#allocation2] sm:$0x1] }
  0x1e   :  { %155 = vpow2.f32 %v79_v33  ;;  %vm115_vm3 = vcmp.eq.f32.partialorder %v107_v61, -inf }
  0x1f   :  { %157 = vpow2.f32 %v81_v34 }
  0x20   :  { %159 = vpow2.f32 %v63_v36 }
  0x29   :  { %v152_v37 = vpop.eup %151 }
  0x2a   :  { %v154_v38 = vpop.eup %153  ;;  %v83_v39 = vsel %vm46_vm1, %v152_v37, 0.0 }
  0x2b   :  { %v156_v40 = vpop.eup %155  ;;  %v84_v41 = vsel %vm46_vm1, %v154_v38, 0.0 }
  0x2c   :  { %v158_v42 = vpop.eup %157  ;;  %v85_v43 = vadd.f32 %v84_v41, %v83_v39  ;;  %v86_v44 = vsel %vm46_vm1, %v156_v40, 0.0 }
  0x2d   :  { %v88_v45 = vsel %vm46_vm1, %v158_v42, 0.0  ;;  %v160_v51 = vpop.eup %159 }
  0x2e   :  { %v87_v46 = vadd.f32 %v86_v44, %v85_v43  ;;  %v97_v55 = vmul.f32 %v160_v51, %v96_v52 }
  0x30   :  { %v89_v47 = vadd.f32 %v88_v45, %v87_v46 }
  0x32   :  { %v90_v48 = vrot.slane %v89_v47, 4 }
  0x34   :  { %v91_v49 = vadd.f32 %v90_v48, %v89_v47 }
  0x36   :  { %v92_v50 = vrot.slane %v91_v49, 2 }
  0x38   :  { %v93_v53 = vadd.f32 %v92_v50, %v91_v49 }
  0x3a   :  { %v94_v54 = vrot.slane %v93_v53, 1 }
  0x3c   :  { %v95_v56 = vadd.f32 %v94_v54, %v93_v53 }
  0x3e   :  { %v98_v57 = vadd.f32 %v97_v55, %v95_v56 }
  0x40   :  { %v100_v58 = vsel %vm99_vm2, 0.0, %v98_v57 }
  0x41   :  { %103 = vst.msk [vmem:[#allocation3] sm:$0x1] %vm20_vm0, %v100_v58 }
  0x44   :  { %s145_s23 = spop %144 }
  0x45   :  { %v126_v4 = vstv %s145_s23 }
  0x48   :  { %v108_v59 = vld [vmem:[#allocation3] sm:$0x1] }
  0x49   :  { %161 = vlog2.f32 %v108_v59 }
  0x56   :  { %v162_v60 = vpop.eup %161 }
  0x57   :  { %v110_v62 = vmul.f32 0.6931472, %v162_v60 }
  0x59   :  { %v111_v0 = vadd.f32 %v110_v62, %v107_v61 }
  0x5b   :  { %v113_v1 = vadd.f32 %v112_v63, %v111_v0 }
  0x5d   :  { %vm114_vm4 = vcmp.ne.f32.partialorder %v113_v1, %v113_v1 }
  0x5e   :  { %vm116_vm5 = vmor %vm114_vm4, %vm115_vm3 }
  0x5f   :  { %v117_v2 = vsel %vm116_vm5, 0.0, %v113_v1 }
  0x60   :  { %v123_v3 = vsel %vm20_vm0, %v117_v2, 0.0 }
  0x61   :  { %124 = vadd.xlane.f32.xlu0 %v123_v3 }
  0xea   :  { %v125_v5 = vpop.xlane.xlu0 %124 }
  0xeb   :  { %v127_v6 = vmul.f32 %v126_v4, %v125_v5 }
  0xed   :  { %129 = vst.msk [vmem:[#allocation5] sm:$0x1] %vm128_vm6, %v127_v6 }
  0xee   :  { %174 = shalt.err (!%p171_p4)
}
  0xef   :  { %139 = dma.vmem_to_hbm [thread:$0]  %s137_s25, 16, %s245_s3, [#allocation6]  }
  0xf0   :  { %183 = dma.done.wait [#allocation6], 16  }
  0xf1   :  { %184 = vsyncadd [#allocation6], 4294967280 }
  0xf2   :  { %143 = vsyncpa [#allocation6], 1 }

</bundles_post_ra>
